<compile_context>
chip_gen: v7x
topology: tpu7x:2x2x1
jax: 0.10.0
libtpu: 0.0.40
codegen_flags: <defaults>
</compile_context>

<pallas_src>
import math

import jax
import jax.numpy as jnp
from jax import lax
from jax.experimental import pallas as pl
from jax.experimental.pallas import tpu as pltpu

_LANES = 128          # lane width (last dim of every block)
_ACC_ROWS = 8         # sublane height of the resident accumulator block
_CHUNK_ROWS = 256     # rows folded per inner-loop iteration (32 f32 vregs)
_ROW_ALIGN = 32       # row granularity of tiles (covers f32/bf16/int8 packing)


# --------------------------------------------------------------------------
# Device-generation heuristics.
# --------------------------------------------------------------------------
def _device_kind():
    try:
        return jax.devices()[0].device_kind.lower()
    except Exception:
        return ""


def _default_num_cores():
    # v7x has 2 TensorCores per chip; v5e/v6e have 1 (a size-2 "parallel"
    # axis there would just serialize and double padding granularity).
    return 2 if "v7" in _device_kind() else 1


def _default_max_block_rows():
    kind = _device_kind()
    if "v5" in kind:
        return 4096   # v5e scoped-VMEM default is 16 MiB
    return 8192       # v6e (128 MiB VMEM) / v7x (64 MiB, limit set explicitly)


# --------------------------------------------------------------------------
# Kernel.
# --------------------------------------------------------------------------
def _accumulate_slice(labels_ref, classes_ref, row0, n_rows, acc):
    """Fold n_rows x 128 of the margin loss onto the (8,128) accumulator."""
    lab = labels_ref[pl.ds(row0, n_rows), :].astype(jnp.float32)
    cls = classes_ref[pl.ds(row0, n_rows), :].astype(jnp.float32)

    left = jnp.maximum(0.9 - cls, 0.0)
    left = left * left
    right = jnp.maximum(cls - 0.1, 0.0)
    right = right * right
    half_right = 0.5 * right
    # labels*left + 0.5*(1-labels)*right == half_right + labels*(left - half_right)
    margin = half_right + lab * (left - half_right)

    # Pure-VPU sublane fold; no per-chunk cross-lane XLU reduce.
    return acc + margin.reshape(n_rows // _ACC_ROWS, _ACC_ROWS, _LANES).sum(axis=0)


def _capsule_loss_kernel(labels_ref, classes_ref, out_ref):
    # out_ref: (8, 128) f32 partial-sum block.  Its block index depends only
    # on the leading (parallel) grid axis, so it stays resident in VMEM
    # across the inner (reduction) axis.
    @pl.when(pl.program_id(1) == 0)
    def _():
        out_ref[...] = jnp.zeros_like(out_ref)

    br = labels_ref.shape[0]          # static tile height
    n_full = br // _CHUNK_ROWS
    rem = br - n_full * _CHUNK_ROWS   # static, multiple of _ROW_ALIGN

    acc = jnp.zeros((_ACC_ROWS, _LANES), jnp.float32)

    if n_full > 0:
        def body(c, a):
            r0 = pl.multiple_of(c * _CHUNK_ROWS, _CHUNK_ROWS)
            return _accumulate_slice(labels_ref, classes_ref, r0, _CHUNK_ROWS, a)

        acc = lax.fori_loop(0, n_full, body, acc)

    if rem > 0:
        acc = _accumulate_slice(labels_ref, classes_ref, n_full * _CHUNK_ROWS, rem, acc)

    out_ref[...] += acc


# --------------------------------------------------------------------------
# Wrapper.
# --------------------------------------------------------------------------
def capsule_loss_ref(labels, classes):
    labels = jnp.asarray(labels, jnp.float32)
    classes = jnp.asarray(classes, jnp.float32)
    left = jnp.maximum(0.9 - classes, 0.0) ** 2
    right = jnp.maximum(classes - 0.1, 0.0) ** 2
    return jnp.sum(labels * left + 0.5 * (1.0 - labels) * right)


def capsule_loss_pallas(labels, classes, *, max_block_rows=None, num_cores=None):
    """Margin loss via Pallas. labels/classes: same shape, any rank/dtype."""
    labels = jnp.asarray(labels)
    classes = jnp.asarray(classes)
    assert labels.shape == classes.shape
    total = int(math.prod(labels.shape)) if labels.shape else 1
    if total == 0:
        return jnp.zeros((), jnp.float32)

    if num_cores is None:
        num_cores = _default_num_cores()
    if max_block_rows is None:
        max_block_rows = _default_max_block_rows()
    max_br = max(_ROW_ALIGN, (max_block_rows // _ROW_ALIGN) * _ROW_ALIGN)

    # Native-dtype flatten (bitcast-level reshape; no astype pass in HBM).
    flat_l = labels.reshape(-1)
    flat_c = classes.reshape(-1)
    rows = total // _LANES            # full 128-lane rows available

    if rows >= _ROW_ALIGN:
        # ---- main path: exactly-tileable lane-dense prefix, tiny XLA tail.
        n_par = num_cores if rows >= num_cores * 1024 else 1
        tiles_per_par = max(1, pl.cdiv(rows, n_par * max_br))
        br = (rows // (n_par * tiles_per_par)) // _ROW_ALIGN * _ROW_ALIGN
        br = max(_ROW_ALIGN, br)
        covered_rows = n_par * tiles_per_par * br          # <= rows
        main = covered_rows * _LANES
        if main == total:
            lab2d = flat_l.reshape(covered_rows, _LANES)
            cls2d = flat_c.reshape(covered_rows, _LANES)
        else:
            lab2d = flat_l[:main].reshape(covered_rows, _LANES)
            cls2d = flat_c[:main].reshape(covered_rows, _LANES)
    else:
        # ---- tiny forced-Pallas path: pad one tile (negligible copy).
        # Zero labels + zero classes contribute exactly 0 to the loss.
        n_par, tiles_per_par, br = 1, 1, _ROW_ALIGN
        covered_rows = br
        main = total
        pad = covered_rows * _LANES - total
        lab2d = jnp.pad(flat_l, (0, pad)).reshape(covered_rows, _LANES)
        cls2d = jnp.pad(flat_c, (0, pad)).reshape(covered_rows, _LANES)

    # VMEM budget: 2 inputs x 2 pipeline buffers of (br, 128) native-dtype
    # tiles + chunk-scale temporaries.  Capped at 32 MiB (safe on v7x's
    # 64 MiB physical / 32 MiB scoped-default VMEM).
    in_bytes_per_step = br * _LANES * (lab2d.dtype.itemsize + cls2d.dtype.itemsize)
    vmem_limit = min(32 << 20, max(16 << 20, 2 * in_bytes_per_step + (8 << 20)))

    cost = pl.CostEstimate(
        flops=11 * covered_rows * _LANES,
        transcendentals=0,
        bytes_accessed=covered_rows * _LANES
        * (lab2d.dtype.itemsize + cls2d.dtype.itemsize)
        + n_par * _ACC_ROWS * _LANES * 4,
    )

    in_map = lambda p, t: (p * tiles_per_par + t, 0)
    partials = pl.pallas_call(
        _capsule_loss_kernel,
        out_shape=jax.ShapeDtypeStruct((n_par * _ACC_ROWS, _LANES), jnp.float32),
        grid_spec=pltpu.PrefetchScalarGridSpec(
            num_scalar_prefetch=0,
            grid=(n_par, tiles_per_par),
            in_specs=[
                pl.BlockSpec((br, _LANES), in_map),
                pl.BlockSpec((br, _LANES), in_map),
            ],
            out_specs=pl.BlockSpec((_ACC_ROWS, _LANES), lambda p, t: (p, 0)),
        ),
        compiler_params=pltpu.CompilerParams(
            # TODO(synk): on v7x, verify with a profile that "parallel" shards
            # the leading axis across both TensorCores; switch to
            # pltpu.CORE_PARALLEL if one core sits idle.
            dimension_semantics=("parallel", "arbitrary"),
            vmem_limit_bytes=vmem_limit,
        ),
        cost_estimate=cost,
    )(lab2d, cls2d)

    # Final tiny cross-lane reduction ((n_par*8)x128 elements) done by XLA.
    loss = jnp.sum(partials)

    if main < total:
        # Ragged tail (< n_par*tiles_per_par*_ROW_ALIGN rows + sub-row rest):
        # one small fused XLA reduction, no full-array pad copy.
        loss = loss + capsule_loss_ref(flat_l[main:], flat_c[main:])
    return loss


def capsule_loss(labels, classes, *, min_pallas_elements=1 << 16):
    """Dispatcher: tiny problems are cheaper as a fused XLA expression."""
    if int(math.prod(jnp.shape(labels))) < min_pallas_elements:
        return capsule_loss_ref(labels, classes)
    return capsule_loss_pallas(labels, classes)


if __name__ == "__main__":
    key = jax.random.PRNGKey(0)
    ks = jax.random.split(key, 6)

    # Small shape consistent with the module: [batch, num_classes].
    batch, num_classes = 8, 16
    classes = jax.random.uniform(ks[0], (batch, num_classes), dtype=jnp.float32)
    labels = jax.nn.one_hot(
        jax.random.randint(ks[1], (batch,), 0, num_classes), num_classes,
        dtype=jnp.float32)
    loss = capsule_loss_pallas(labels, classes)  # force the Pallas path
    jax.block_until_ready(loss)
    ref = capsule_loss_ref(labels, classes)
    assert jnp.allclose(loss, ref, rtol=1e-5, atol=1e-5), (loss, ref)

    # Moderate, non-128-aligned shape: tiled main path + in-kernel chunk loop
    # + XLA tail for the ragged remainder.
    b2, c2 = 999, 160
    classes2 = jax.random.uniform(ks[2], (b2, c2), dtype=jnp.float32)
    labels2 = jax.nn.one_hot(
        jax.random.randint(ks[3], (b2,), 0, c2), c2, dtype=jnp.float32)
    loss2 = capsule_loss_pallas(labels2, classes2)
    jax.block_until_ready(loss2)
    ref2 = capsule_loss_ref(labels2, classes2)
    assert jnp.allclose(loss2, ref2, rtol=1e-4, atol=1e-2), (loss2, ref2)

    # Native-dtype streaming: bf16 classes + f32 one-hot labels, cast in-kernel.
    b3, c3 = 512, 64
    classes3 = jax.random.uniform(ks[4], (b3, c3), dtype=jnp.float32).astype(jnp.bfloat16)
    labels3 = jax.nn.one_hot(
        jax.random.randint(ks[5], (b3,), 0, c3), c3, dtype=jnp.float32)
    loss3 = capsule_loss_pallas(labels3, classes3)
    jax.block_until_ready(loss3)
    ref3 = capsule_loss_ref(labels3, classes3.astype(jnp.float32))
    assert jnp.allclose(loss3, ref3, rtol=1e-3, atol=1e-1), (loss3, ref3)

    print("KERNEL_OK")
</pallas_src>

<mosaic_0001>
module attributes {stable_mosaic.version = 11 : i64} {
  func.func @_capsule_loss_kernel(%arg0: i32, %arg1: i32, %arg2: memref<32x128xf32, #tpu.memory_space<vmem>>, %arg3: memref<32x128xf32, #tpu.memory_space<vmem>>, %arg4: memref<8x128xf32, #tpu.memory_space<vmem>>) attributes {dimension_semantics = [#tpu.dimension_semantics<parallel>, #tpu.dimension_semantics<arbitrary>], iteration_bounds = array<i64: 1, 1>, scalar_prefetch = 0 : i64, scratch_operands = 0 : i64, tpu.core_type = #tpu.core_type<tc>, window_params = [{transform_indices = @transform_0, window_bounds = array<i64: 32, 128>}, {transform_indices = @transform_1, window_bounds = array<i64: 32, 128>}, {transform_indices = @transform_2, window_bounds = array<i64: 8, 128>}]} {
    %c0_i32 = arith.constant 0 : i32
    %0 = arith.cmpi eq, %arg1, %c0_i32 : i32
    %1 = arith.extui %0 : i1 to i32
    %c0_i32_0 = arith.constant 0 : i32
    %2 = arith.cmpi ne, %1, %c0_i32_0 : i32
    scf.if %2 {
      %cst_14 = arith.constant 0.000000e+00 : f32
      %27 = vector.broadcast %cst_14 : f32 to vector<8x128xf32>
      %c0_15 = arith.constant 0 : index
      %c0_16 = arith.constant 0 : index
      %28 = vector.load %arg4[%c0_15, %c0_16] : memref<8x128xf32, #tpu.memory_space<vmem>>, vector<8x128xf32>
      tpu.vector_store %arg4[%c0_15, %c0_16], %27 {strides = array<i32>} : memref<8x128xf32, #tpu.memory_space<vmem>>, vector<8x128xf32>,
    } else {
    }
    %cst = arith.constant 0.000000e+00 : f32
    %3 = vector.broadcast %cst : f32 to vector<8x128xf32>
    %c0 = arith.constant 0 : index
    %c0_1 = arith.constant 0 : index
    %4 = vector.load %arg2[%c0, %c0_1] : memref<32x128xf32, #tpu.memory_space<vmem>>, vector<32x128xf32>
    %c0_2 = arith.constant 0 : index
    %c0_3 = arith.constant 0 : index
    %5 = vector.load %arg3[%c0_2, %c0_3] : memref<32x128xf32, #tpu.memory_space<vmem>>, vector<32x128xf32>
    %cst_4 = arith.constant 0.899999976 : f32
    %6 = vector.broadcast %cst_4 : f32 to vector<32x128xf32>
    %7 = arith.subf %6, %5 : vector<32x128xf32>
    %cst_5 = arith.constant 0.000000e+00 : f32
    %8 = vector.broadcast %cst_5 : f32 to vector<32x128xf32>
    %9 = arith.maximumf %7, %8 : vector<32x128xf32>
    %10 = arith.mulf %9, %9 : vector<32x128xf32>
    %cst_6 = arith.constant 1.000000e-01 : f32
    %11 = vector.broadcast %cst_6 : f32 to vector<32x128xf32>
    %12 = arith.subf %5, %11 : vector<32x128xf32>
    %cst_7 = arith.constant 0.000000e+00 : f32
    %13 = vector.broadcast %cst_7 : f32 to vector<32x128xf32>
    %14 = arith.maximumf %12, %13 : vector<32x128xf32>
    %15 = arith.mulf %14, %14 : vector<32x128xf32>
    %cst_8 = arith.constant 5.000000e-01 : f32
    %16 = vector.broadcast %cst_8 : f32 to vector<32x128xf32>
    %17 = arith.mulf %16, %15 : vector<32x128xf32>
    %18 = arith.subf %10, %17 : vector<32x128xf32>
    %19 = arith.mulf %4, %18 : vector<32x128xf32>
    %20 = arith.addf %17, %19 : vector<32x128xf32>
    %21 = vector.shape_cast %20 : vector<32x128xf32> to vector<4x8x128xf32>
    %cst_9 = arith.constant dense<0.000000e+00> : vector<8x128xf32>
    %22 = vector.multi_reduction <add>, %21, %cst_9 [0] : vector<4x8x128xf32> to vector<8x128xf32>
    %23 = arith.addf %3, %22 : vector<8x128xf32>
    %c0_10 = arith.constant 0 : index
    %c0_11 = arith.constant 0 : index
    %24 = vector.load %arg4[%c0_10, %c0_11] : memref<8x128xf32, #tpu.memory_space<vmem>>, vector<8x128xf32>
    %25 = arith.addf %24, %23 : vector<8x128xf32>
    %c0_12 = arith.constant 0 : index
    %c0_13 = arith.constant 0 : index
    %26 = vector.load %arg4[%c0_12, %c0_13] : memref<8x128xf32, #tpu.memory_space<vmem>>, vector<8x128xf32>
    tpu.vector_store %arg4[%c0_12, %c0_13], %25 {strides = array<i32>} : memref<8x128xf32, #tpu.memory_space<vmem>>, vector<8x128xf32>,
    return
  }
  func.func @transform_0(%arg0: i32, %arg1: i32) -> (i32, i32) {
    %c1_i32 = arith.constant 1 : i32
    %0 = arith.muli %arg0, %c1_i32 : i32
    %1 = arith.addi %0, %arg1 : i32
    %c0_i32 = arith.constant 0 : i32
    %c0_i32_0 = arith.constant 0 : i32
    return %1, %c0_i32 : i32, i32
  }
  func.func @transform_1(%arg0: i32, %arg1: i32) -> (i32, i32) {
    %c1_i32 = arith.constant 1 : i32
    %0 = arith.muli %arg0, %c1_i32 : i32
    %1 = arith.addi %0, %arg1 : i32
    %c0_i32 = arith.constant 0 : i32
    %c0_i32_0 = arith.constant 0 : i32
    return %1, %c0_i32 : i32, i32
  }
  func.func @transform_2(%arg0: i32, %arg1: i32) -> (i32, i32) {
    %c0_i32 = arith.constant 0 : i32
    %c0_i32_0 = arith.constant 0 : i32
    return %arg0, %c0_i32 : i32, i32
  }
}

</mosaic_0001>

<bundles_post_ra>
// kernel: tpu_custom_call.1
= control target key start
LH: loop header
LB: loop body
LE: loop exit
PB: predicated region body
PF: predicated region fallthrough
CT: control target
= control target key end

     0   :  { %7 = vsyncpa [#allocation3], 0  ;;  %s266_s0 = inlined_call_operand.hbm [shape: f32[32,128], index: 0, kind: input, shape index: {}]   ;;  %s267_s1 = inlined_call_operand.hbm [shape: f32[32,128], index: 1, kind: input, shape index: {}]   ;;  %s268_s2 = inlined_call_operand.hbm [shape: f32[8,128], index: 2, kind: output, shape index: {}]  }
   0x1   :  { %8 = vsyncpa [#allocation6], 0 }
   0x2   :  { %9 = vsyncpa [#allocation4], 0  ;;  %s210_s9 = smov [#allocation2]   ;;  %s138_s13 = scalar_lea.hbm %s266_s0, 512 }
   0x3   :  { %s19_s10 = sshll.u32 %s210_s9, 4  ;;  %p139_p0 = scmp.ne.s32.totalorder %s266_s0, %s138_s13  ;;  %s20_s10 = int_to_ptr.vmem [resolvable:$true] %s19_s10 }
   0x4   :  { %p142_p1 = scmp.lt.u32.totalorder %s138_s13, %s266_s0 }
   0x6   :  { %p144_p2 = pnand %p142_p1, %p139_p0 }
   0x8   :  { %147 = shalt.err (!%p144_p2)
}
   0x9   :  { %s148_s18 = scalar_lea.vmem %s20_s10, 512  ;;  %p153_p4 = scmp.lt.s32.totalorder %s20_s10, %s20_s10 }
   0xa   :  { %p149_p3 = scmp.ne.s32.totalorder %s20_s10, %s148_s18  ;;  %p154_p5 = scmp.lt.s32.totalorder %s148_s18, %s148_s18 }
   0xc   :  { %p155_p6 = por %p154_p5, %p153_p4 }
   0xe   :  { %p156_p7 = pnand %p155_p6, %p149_p3 }
  0x10   :  { %159 = shalt.err (!%p156_p7)
}
  0x11   :  { %s211_s19 = smov 128   ;;  %s212_s20 = smov 8  }
  0x12   :  { %25 = dma.hbm_to_vmem [thread:$0]  %s266_s0, 512, %s20_s10, [#allocation3], %s211_s19, %s211_s19, %s212_s20  }
  0x13   :  { %s213_s23 = smov [#allocation5]   ;;  %s160_s27 = scalar_lea.hbm %s267_s1, 512 }
  0x14   :  { %s35_s24 = sshll.u32 %s213_s23, 4  ;;  %p161_p8 = scmp.ne.s32.totalorder %s267_s1, %s160_s27  ;;  %s36_s24 = int_to_ptr.vmem [resolvable:$true] %s35_s24 }
  0x15   :  { %p164_p9 = scmp.lt.u32.totalorder %s160_s27, %s267_s1 }
  0x17   :  { %p166_p10 = pnand %p164_p9, %p161_p8 }
  0x19   :  { %169 = shalt.err (!%p166_p10)
}
  0x1a   :  { %s170_s4 = scalar_lea.vmem %s36_s24, 512  ;;  %p175_p12 = scmp.lt.s32.totalorder %s36_s24, %s36_s24 }
  0x1b   :  { %p171_p11 = scmp.ne.s32.totalorder %s36_s24, %s170_s4  ;;  %p176_p13 = scmp.lt.s32.totalorder %s170_s4, %s170_s4 }
  0x1d   :  { %p177_p0 = por %p176_p13, %p175_p12 }
  0x1f   :  { %p178_p1 = pnand %p177_p0, %p171_p11 }
  0x21   :  { %181 = shalt.err (!%p178_p1)
}
  0x22   :  { %41 = dma.hbm_to_vmem [thread:$0]  %s267_s1, 512, %s36_s24, [#allocation6], %s211_s19, %s211_s19, %s212_s20  }
  0x23   :  { %204 = dma.done.wait [#allocation3], 512  }
  0x24   :  { %205 = vsyncadd [#allocation3], 4294966784 }
  0x25   :  { %206 = dma.done.wait [#allocation6], 512  }
  0x26   :  { %207 = vsyncadd [#allocation6], 4294966784  ;;  %v61_v0 = vld [vmem:[#allocation5] sm:$0xff]  ;;  %v62_v1 = vld [vmem:[#allocation5 + $0x8] sm:$0xff]  ;;  %s214_s1 = smov [#allocation7]  }
  0x27   :  { %v63_v2 = vld [vmem:[#allocation5 + $0x10] sm:$0xff]  ;;  %v64_v3 = vld [vmem:[#allocation5 + $0x18] sm:$0xff]  ;;  %v65_v4 = vsub.f32 0.9, %v61_v0  ;;  %v66_v5 = vsub.f32 0.9, %v62_v1 }
  0x28   :  { %v67_v6 = vsub.f32 0.9, %v63_v2  ;;  %v68_v7 = vsub.f32 0.9, %v64_v3  ;;  %v128_v8 = vadd.f32 -0.1, %v61_v0 }
  0x29   :  { %v69_v9 = vmax.f32 %v65_v4, 0.0  ;;  %v70_v10 = vmax.f32 %v66_v5, 0.0  ;;  %v129_v11 = vadd.f32 -0.1, %v62_v1  ;;  %v130_v12 = vadd.f32 -0.1, %v63_v2 }
  0x2a   :  { %v71_v13 = vmax.f32 %v67_v6, 0.0  ;;  %v72_v14 = vmax.f32 %v68_v7, 0.0  ;;  %v131_v15 = vadd.f32 -0.1, %v64_v3  ;;  %v81_v16 = vmax.f32 %v128_v8, 0.0  ;;  %v57_v29 = vld [vmem:[#allocation2] sm:$0xff] }
  0x2b   :  { %v82_v17 = vmax.f32 %v129_v11, 0.0  ;;  %v83_v18 = vmax.f32 %v130_v12, 0.0  ;;  %v73_v19 = vmul.f32 %v69_v9, %v69_v9  ;;  %v74_v22 = vmul.f32 %v70_v10, %v70_v10  ;;  %v58_v32 = vld [vmem:[#allocation2 + $0x8] sm:$0xff]  ;;  %v59_v33 = vld [vmem:[#allocation2 + $0x10] sm:$0xff]  ;;  %v60_v36 = vld [vmem:[#allocation2 + $0x18] sm:$0xff]  ;;  %s118_s6 = sshll.u32 %s214_s1, 4  ;;  %s119_s6 = int_to_ptr.vmem [resolvable:$true] %s118_s6 }
  0x2c   :  { %v84_v20 = vmax.f32 %v131_v15, 0.0  ;;  %v85_v21 = vmul.f32 %v81_v16, %v81_v16  ;;  %v75_v23 = vmul.f32 %v71_v13, %v71_v13  ;;  %v76_v26 = vmul.f32 %v72_v14, %v72_v14  ;;  %s182_s7 = scalar_lea.vmem %s119_s6, 128  ;;  %p187_p3 = scmp.lt.s32.totalorder %s119_s6, %s119_s6 }
  0x2d   :  { %v86_v24 = vmul.f32 %v82_v17, %v82_v17  ;;  %v87_v25 = vmul.f32 %v83_v18, %v83_v18  ;;  %p183_p2 = scmp.ne.s32.totalorder %s119_s6, %s182_s7  ;;  %p188_p4 = scmp.lt.s32.totalorder %s182_s7, %s182_s7 }
  0x2e   :  { %v88_v27 = vmul.f32 %v84_v20, %v84_v20  ;;  %v89_v28 = vmul.f32 0.5, %v85_v21 }
  0x2f   :  { %v90_v30 = vmul.f32 0.5, %v86_v24  ;;  %v91_v31 = vmul.f32 0.5, %v87_v25  ;;  %p189_p5 = por %p188_p4, %p187_p3 }
  0x30   :  { %v92_v34 = vmul.f32 0.5, %v88_v27  ;;  %v93_v35 = vsub.f32 %v73_v19, %v89_v28 }
  0x31   :  { %v94_v37 = vsub.f32 %v74_v22, %v90_v30  ;;  %v95_v38 = vsub.f32 %v75_v23, %v91_v31  ;;  %p190_p6 = pnand %p189_p5, %p183_p2 }
  0x32   :  { %v96_v39 = vsub.f32 %v76_v26, %v92_v34  ;;  %v97_v40 = vmul.f32 %v93_v35, %v57_v29 }
  0x33   :  { %v98_v41 = vmul.f32 %v94_v37, %v58_v32  ;;  %v99_v42 = vmul.f32 %v95_v38, %v59_v33 }
  0x34   :  { %v100_v43 = vmul.f32 %v96_v39, %v60_v36  ;;  %v101_v44 = vadd.f32 %v97_v40, %v89_v28 }
  0x35   :  { %v102_v45 = vadd.f32 %v98_v41, %v90_v30  ;;  %v103_v46 = vadd.f32 %v99_v42, %v91_v31 }
  0x36   :  { %v104_v47 = vadd.f32 %v100_v43, %v92_v34 }
  0x37   :  { %v105_v48 = vadd.f32 %v102_v45, %v101_v44 }
  0x39   :  { %v106_v49 = vadd.f32 %v105_v48, %v103_v46 }
  0x3b   :  { %v107_v50 = vadd.f32 %v106_v49, %v104_v47 }
  0x3d   :  { %111 = vst [vmem:[#allocation7] sm:$0xff] %v107_v50 }
  0x3e   :  { %193 = shalt.err (!%p190_p6)
}
  0x3f   :  { %s194_s10 = scalar_lea.hbm %s268_s2, 128 }
  0x40   :  { %p195_p7 = scmp.ne.s32.totalorder %s268_s2, %s194_s10  ;;  %p198_p8 = scmp.lt.u32.totalorder %s194_s10, %s268_s2 }
  0x42   :  { %p200_p9 = pnand %p198_p8, %p195_p7 }
  0x44   :  { %203 = shalt.err (!%p200_p9)
}
  0x45   :  { %121 = dma.vmem_to_hbm [thread:$0]  %s119_s6, 128, %s268_s2, [#allocation4]  }
  0x46   :  { %208 = dma.done.wait [#allocation4], 128  }
  0x47   :  { %209 = vsyncadd [#allocation4], 4294967168 }
  0x48   :  { %125 = vsyncpa [#allocation3], 1 }
  0x49   :  { %126 = vsyncpa [#allocation6], 1 }
  0x4a   :  { %127 = vsyncpa [#allocation4], 1 }

</bundles_post_ra>
